<compile_context>
chip_gen: v7x
topology: tpu7x:2x2x1
jax: 0.10.0
libtpu: 0.0.40
codegen_flags: <defaults>
</compile_context>

<pallas_src>
import numpy as np
import jax
import jax.numpy as jnp
from jax.experimental import pallas as pl
from jax.experimental.pallas import tpu as pltpu


def attention_kernel(h_ref, v_ref, w1_ref, w2_ref, b_ref, w3_ref,
                     sel_ref, colsel_ref, rowsel_ref, a_ref):
    B, F = a_ref.shape
    P = w2_ref.shape[0]
    BF = B * F

    # (1) hidden projection ONCE per batch row; both linear biases pre-fused in b_ref.
    hp = jnp.dot(h_ref[...], w1_ref[...], preferred_element_type=jnp.float32) + b_ref[...]   # (B, P)

    # (2) frame projection for all (batch, frame) rows at once, batch-major (natural v
    #     layout; leading-dim merge is layout-trivial because F is a multiple of 8).
    vflat = v_ref[...].reshape(BF, P)                                                        # (B*F, P)
    u = jnp.dot(vflat, w2_ref[...], preferred_element_type=jnp.float32)                      # (B*F, P)

    # (3) replicate hp across frames with a constant one-hot selector matmul (MXU slot,
    #     no relayout, no wrapper-side tile).
    hpb = jnp.dot(sel_ref[...], hp, preferred_element_type=jnp.float32)                      # (B*F, P)

    # (4) tanh(linear1(h) + linear2(v_f)) then linear3 (no bias) reduced over P.
    x = jnp.tanh(u + hpb)                                                                    # (B*F, P)
    e_col = jnp.sum(x * w3_ref[...], axis=-1, keepdims=True)                                 # (B*F, 1)

    # (5) torch.cat(e, 0).view(B, F) quirk, factorized into two tiny one-hot ops applied to
    #     the 1-wide score column:  e[b', f'] = e_col[m]  where the cat-order index of
    #     batch-major row m equals b'*F + f'.  One VPU lane-broadcast mul + one tiny matmul.
    e = jnp.dot(rowsel_ref[...], e_col * colsel_ref[...],
                preferred_element_type=jnp.float32)                                          # (B, F)

    # (6) row-wise softmax; reciprocal on the EUP (approx) instead of a VPU divide.
    m = jnp.max(e, axis=-1, keepdims=True)
    p = jnp.exp(e - m)
    a_ref[...] = p * pl.reciprocal(jnp.sum(p, axis=-1, keepdims=True), approx=True)


@jax.jit
def attention_layer(h, v, w1, b1, w2, b2, w3):
    B, H = h.shape
    _, F, P = v.shape
    BF = B * F

    # Fused bias and 2-D view of the 1-D weight (metadata-only under jit).
    b12 = (b1 + b2).reshape(1, P)
    w3r = w3.reshape(1, P)

    # Constant 0/1 matrices (baked into the executable; negligible size, no runtime cost).
    # Batch-major row m = (batch m//F, frame m%F); its torch.cat flat position is
    # k = (m%F)*B + m//F, which the .view(B, F) reads at (row k//F, col k%F).
    m_idx = np.arange(BF)
    k_idx = (m_idx % F) * B + (m_idx // F)
    sel = np.zeros((BF, B), np.float32)
    sel[m_idx, m_idx // F] = 1.0                 # replicate hp across frames (batch-major)
    colsel = np.zeros((BF, F), np.float32)
    colsel[m_idx, k_idx % F] = 1.0               # target column of score row m
    rowsel = np.zeros((B, BF), np.float32)
    rowsel[k_idx // F, m_idx] = 1.0              # target row of score row m

    def spec(shape):
        return pl.BlockSpec(shape, lambda i: (0,) * len(shape))

    return pl.pallas_call(
        attention_kernel,
        out_shape=jax.ShapeDtypeStruct((B, F), jnp.float32),
        grid=(1,),
        in_specs=[
            spec((B, H)),       # h
            spec((B, F, P)),    # v (natural layout, no wrapper transpose)
            spec((H, P)),       # w1
            spec((P, P)),       # w2
            spec((1, P)),       # b1 + b2 fused
            spec((1, P)),       # w3
            spec((BF, B)),      # constant hp selector
            spec((BF, F)),      # constant column one-hot (cat/view quirk)
            spec((B, BF)),      # constant row one-hot (cat/view quirk)
        ],
        out_specs=spec((B, F)),
        compiler_params=pltpu.CompilerParams(dimension_semantics=("arbitrary",)),
    )(h, v, w1, w2, b12, w3r, sel, colsel, rowsel)


def reference(h, v, w1, b1, w2, b2, w3):
    """Pure-JAX transcription of the PyTorch forward (including the cat/view quirk)."""
    B, F, P = v.shape
    e = []
    for i in range(F):
        x = jnp.tanh(h @ w1 + b1 + v[:, i, :] @ w2 + b2)
        e.append(x @ w3.reshape(P, 1))                 # (B, 1)
    e = jnp.concatenate(e, axis=0)                     # (F*B, 1), frame-major
    return jax.nn.softmax(e.reshape(B, F), axis=-1)


if __name__ == "__main__":
    B, F, H, P = 2, 8, 32, 32                          # bsz, num_frames, hidden, projected
    key = jax.random.PRNGKey(0)
    k = jax.random.split(key, 7)
    h = jax.random.normal(k[0], (B, H), jnp.float32)
    v = jax.random.normal(k[1], (B, F, P), jnp.float32)
    # Deterministic nn.Linear-style init: U(-1/sqrt(fan_in), 1/sqrt(fan_in))
    w1 = jax.random.uniform(k[2], (H, P), jnp.float32, -1.0 / H**0.5, 1.0 / H**0.5)
    b1 = jax.random.uniform(k[3], (P,),   jnp.float32, -1.0 / H**0.5, 1.0 / H**0.5)
    w2 = jax.random.uniform(k[4], (P, P), jnp.float32, -1.0 / P**0.5, 1.0 / P**0.5)
    b2 = jax.random.uniform(k[5], (P,),   jnp.float32, -1.0 / P**0.5, 1.0 / P**0.5)
    w3 = jax.random.uniform(k[6], (P,),   jnp.float32, -1.0 / P**0.5, 1.0 / P**0.5)

    a = attention_layer(h, v, w1, b1, w2, b2, w3)
    jax.block_until_ready(a)

    a_ref = reference(h, v, w1, b1, w2, b2, w3)
    assert a.shape == (B, F)
    # Tolerance slightly relaxed vs f32-exact because the softmax denominator uses the
    # EUP approximate reciprocal; any logic bug would be orders of magnitude larger.
    assert bool(jnp.allclose(a, a_ref, atol=2e-3, rtol=2e-3)), "mismatch vs JAX reference"
    print("KERNEL_OK")
</pallas_src>

<mosaic_0001>
module attributes {stable_mosaic.version = 11 : i64} {
  func.func @attention_kernel(%arg0: i32, %arg1: memref<2x32xf32, #tpu.memory_space<vmem>>, %arg2: memref<2x8x32xf32, #tpu.memory_space<vmem>>, %arg3: memref<32x32xf32, #tpu.memory_space<vmem>>, %arg4: memref<32x32xf32, #tpu.memory_space<vmem>>, %arg5: memref<1x32xf32, #tpu.memory_space<vmem>>, %arg6: memref<1x32xf32, #tpu.memory_space<vmem>>, %arg7: memref<16x2xf32, #tpu.memory_space<vmem>>, %arg8: memref<16x8xf32, #tpu.memory_space<vmem>>, %arg9: memref<2x16xf32, #tpu.memory_space<vmem>>, %arg10: memref<2x8xf32, #tpu.memory_space<vmem>>) attributes {dimension_semantics = [#tpu.dimension_semantics<arbitrary>], iteration_bounds = array<i64: 1>, scalar_prefetch = 0 : i64, scratch_operands = 0 : i64, tpu.core_type = #tpu.core_type<tc>, window_params = [{pipeline_mode = #tpu.pipeline_mode<synchronous>, transform_indices = @transform_0, window_bounds = array<i64: 2, 32>}, {pipeline_mode = #tpu.pipeline_mode<synchronous>, transform_indices = @transform_1, window_bounds = array<i64: 2, 8, 32>}, {pipeline_mode = #tpu.pipeline_mode<synchronous>, transform_indices = @transform_2, window_bounds = array<i64: 32, 32>}, {pipeline_mode = #tpu.pipeline_mode<synchronous>, transform_indices = @transform_3, window_bounds = array<i64: 32, 32>}, {pipeline_mode = #tpu.pipeline_mode<synchronous>, transform_indices = @transform_4, window_bounds = array<i64: 1, 32>}, {pipeline_mode = #tpu.pipeline_mode<synchronous>, transform_indices = @transform_5, window_bounds = array<i64: 1, 32>}, {pipeline_mode = #tpu.pipeline_mode<synchronous>, transform_indices = @transform_6, window_bounds = array<i64: 16, 2>}, {pipeline_mode = #tpu.pipeline_mode<synchronous>, transform_indices = @transform_7, window_bounds = array<i64: 16, 8>}, {pipeline_mode = #tpu.pipeline_mode<synchronous>, transform_indices = @transform_8, window_bounds = array<i64: 2, 16>}, {pipeline_mode = #tpu.pipeline_mode<synchronous>, transform_indices = @transform_9, window_bounds = array<i64: 2, 8>}]} {
    %c0 = arith.constant 0 : index
    %c0_0 = arith.constant 0 : index
    %0 = vector.load %arg1[%c0, %c0_0] : memref<2x32xf32, #tpu.memory_space<vmem>>, vector<2x32xf32>
    %c0_1 = arith.constant 0 : index
    %c0_2 = arith.constant 0 : index
    %1 = vector.load %arg3[%c0_1, %c0_2] : memref<32x32xf32, #tpu.memory_space<vmem>>, vector<32x32xf32>
    %cst = arith.constant dense<0.000000e+00> : vector<2x32xf32>
    %2 = tpu.matmul %0, %1, %cst {dimension_numbers = #tpu.dot_dimension_numbers<[1], [0], [0], [1], [0, 0, 1, 1], [], []>} : vector<2x32xf32>, vector<32x32xf32>, vector<2x32xf32> -> vector<2x32xf32>
    %c0_3 = arith.constant 0 : index
    %c0_4 = arith.constant 0 : index
    %3 = vector.load %arg5[%c0_3, %c0_4] : memref<1x32xf32, #tpu.memory_space<vmem>>, vector<1x32xf32>
    %4 = vector.broadcast %3 : vector<1x32xf32> to vector<2x32xf32>
    %5 = arith.addf %2, %4 : vector<2x32xf32>
    %c0_5 = arith.constant 0 : index
    %c0_6 = arith.constant 0 : index
    %c0_7 = arith.constant 0 : index
    %6 = vector.load %arg2[%c0_5, %c0_6, %c0_7] : memref<2x8x32xf32, #tpu.memory_space<vmem>>, vector<2x8x32xf32>
    %7 = vector.shape_cast %6 : vector<2x8x32xf32> to vector<16x32xf32>
    %c0_8 = arith.constant 0 : index
    %c0_9 = arith.constant 0 : index
    %8 = vector.load %arg4[%c0_8, %c0_9] : memref<32x32xf32, #tpu.memory_space<vmem>>, vector<32x32xf32>
    %cst_10 = arith.constant dense<0.000000e+00> : vector<16x32xf32>
    %9 = tpu.matmul %7, %8, %cst_10 {dimension_numbers = #tpu.dot_dimension_numbers<[1], [0], [0], [1], [0, 0, 1, 1], [], []>} : vector<16x32xf32>, vector<32x32xf32>, vector<16x32xf32> -> vector<16x32xf32>
    %c0_11 = arith.constant 0 : index
    %c0_12 = arith.constant 0 : index
    %10 = vector.load %arg7[%c0_11, %c0_12] : memref<16x2xf32, #tpu.memory_space<vmem>>, vector<16x2xf32>
    %cst_13 = arith.constant dense<0.000000e+00> : vector<16x32xf32>
    %11 = tpu.matmul %10, %5, %cst_13 {dimension_numbers = #tpu.dot_dimension_numbers<[1], [0], [0], [1], [0, 0, 1, 1], [], []>} : vector<16x2xf32>, vector<2x32xf32>, vector<16x32xf32> -> vector<16x32xf32>
    %12 = arith.addf %9, %11 : vector<16x32xf32>
    %13 = math.tanh %12 : vector<16x32xf32>
    %c0_14 = arith.constant 0 : index
    %c0_15 = arith.constant 0 : index
    %14 = vector.load %arg6[%c0_14, %c0_15] : memref<1x32xf32, #tpu.memory_space<vmem>>, vector<1x32xf32>
    %15 = vector.broadcast %14 : vector<1x32xf32> to vector<16x32xf32>
    %16 = arith.mulf %13, %15 : vector<16x32xf32>
    %cst_16 = arith.constant dense<0.000000e+00> : vector<16xf32>
    %17 = vector.multi_reduction <add>, %16, %cst_16 [1] : vector<16x32xf32> to vector<16xf32>
    %18 = vector.shape_cast %17 : vector<16xf32> to vector<16x1xf32>
    %c0_17 = arith.constant 0 : index
    %c0_18 = arith.constant 0 : index
    %19 = vector.load %arg9[%c0_17, %c0_18] : memref<2x16xf32, #tpu.memory_space<vmem>>, vector<2x16xf32>
    %c0_19 = arith.constant 0 : index
    %c0_20 = arith.constant 0 : index
    %20 = vector.load %arg8[%c0_19, %c0_20] : memref<16x8xf32, #tpu.memory_space<vmem>>, vector<16x8xf32>
    %21 = vector.broadcast %18 : vector<16x1xf32> to vector<16x8xf32>
    %22 = arith.mulf %21, %20 : vector<16x8xf32>
    %cst_21 = arith.constant dense<0.000000e+00> : vector<2x8xf32>
    %23 = tpu.matmul %19, %22, %cst_21 {dimension_numbers = #tpu.dot_dimension_numbers<[1], [0], [0], [1], [0, 0, 1, 1], [], []>} : vector<2x16xf32>, vector<16x8xf32>, vector<2x8xf32> -> vector<2x8xf32>
    %cst_22 = arith.constant dense<0xFF800000> : vector<2xf32>
    %24 = vector.multi_reduction <maximumf>, %23, %cst_22 [1] : vector<2x8xf32> to vector<2xf32>
    %25 = vector.shape_cast %24 : vector<2xf32> to vector<2x1xf32>
    %26 = vector.broadcast %25 : vector<2x1xf32> to vector<2x8xf32>
    %27 = arith.subf %23, %26 : vector<2x8xf32>
    %28 = math.exp %27 : vector<2x8xf32>
    %cst_23 = arith.constant dense<0.000000e+00> : vector<2xf32>
    %29 = vector.multi_reduction <add>, %28, %cst_23 [1] : vector<2x8xf32> to vector<2xf32>
    %30 = vector.shape_cast %29 : vector<2xf32> to vector<2x1xf32>
    %31 = tpu.reciprocal %30 {approx = true} : vector<2x1xf32> -> vector<2x1xf32>
    %32 = vector.broadcast %31 : vector<2x1xf32> to vector<2x8xf32>
    %33 = arith.mulf %28, %32 : vector<2x8xf32>
    %c0_24 = arith.constant 0 : index
    %c0_25 = arith.constant 0 : index
    %34 = vector.load %arg10[%c0_24, %c0_25] : memref<2x8xf32, #tpu.memory_space<vmem>>, vector<2x8xf32>
    tpu.vector_store %arg10[%c0_24, %c0_25], %33 {strides = array<i32>} : memref<2x8xf32, #tpu.memory_space<vmem>>, vector<2x8xf32>,
    return
  }
  func.func @transform_0(%arg0: i32) -> (i32, i32) {
    %c0_i32 = arith.constant 0 : i32
    %c0_i32_0 = arith.constant 0 : i32
    %c0_i32_1 = arith.constant 0 : i32
    return %c0_i32, %c0_i32_0 : i32, i32
  }
  func.func @transform_1(%arg0: i32) -> (i32, i32, i32) {
    %c0_i32 = arith.constant 0 : i32
    %c0_i32_0 = arith.constant 0 : i32
    %c0_i32_1 = arith.constant 0 : i32
    %c0_i32_2 = arith.constant 0 : i32
    return %c0_i32, %c0_i32_0, %c0_i32_1 : i32, i32, i32
  }
  func.func @transform_2(%arg0: i32) -> (i32, i32) {
    %c0_i32 = arith.constant 0 : i32
    %c0_i32_0 = arith.constant 0 : i32
    %c0_i32_1 = arith.constant 0 : i32
    return %c0_i32, %c0_i32_0 : i32, i32
  }
  func.func @transform_3(%arg0: i32) -> (i32, i32) {
    %c0_i32 = arith.constant 0 : i32
    %c0_i32_0 = arith.constant 0 : i32
    %c0_i32_1 = arith.constant 0 : i32
    return %c0_i32, %c0_i32_0 : i32, i32
  }
  func.func @transform_4(%arg0: i32) -> (i32, i32) {
    %c0_i32 = arith.constant 0 : i32
    %c0_i32_0 = arith.constant 0 : i32
    %c0_i32_1 = arith.constant 0 : i32
    return %c0_i32, %c0_i32_0 : i32, i32
  }
  func.func @transform_5(%arg0: i32) -> (i32, i32) {
    %c0_i32 = arith.constant 0 : i32
    %c0_i32_0 = arith.constant 0 : i32
    %c0_i32_1 = arith.constant 0 : i32
    return %c0_i32, %c0_i32_0 : i32, i32
  }
  func.func @transform_6(%arg0: i32) -> (i32, i32) {
    %c0_i32 = arith.constant 0 : i32
    %c0_i32_0 = arith.constant 0 : i32
    %c0_i32_1 = arith.constant 0 : i32
    return %c0_i32, %c0_i32_0 : i32, i32
  }
  func.func @transform_7(%arg0: i32) -> (i32, i32) {
    %c0_i32 = arith.constant 0 : i32
    %c0_i32_0 = arith.constant 0 : i32
    %c0_i32_1 = arith.constant 0 : i32
    return %c0_i32, %c0_i32_0 : i32, i32
  }
  func.func @transform_8(%arg0: i32) -> (i32, i32) {
    %c0_i32 = arith.constant 0 : i32
    %c0_i32_0 = arith.constant 0 : i32
    %c0_i32_1 = arith.constant 0 : i32
    return %c0_i32, %c0_i32_0 : i32, i32
  }
  func.func @transform_9(%arg0: i32) -> (i32, i32) {
    %c0_i32 = arith.constant 0 : i32
    %c0_i32_0 = arith.constant 0 : i32
    %c0_i32_1 = arith.constant 0 : i32
    return %c0_i32, %c0_i32_0 : i32, i32
  }
}

</mosaic_0001>

<bundles_post_ra>
// kernel: attention_layer.1
= control target key start
LH: loop header
LB: loop body
LE: loop exit
PB: predicated region body
PF: predicated region fallthrough
CT: control target
= control target key end

     0   :  { %14 = vsyncpa [#allocation3], 0  ;;  %s857_s0 = inlined_call_operand.vmem [shape: f32[2,32], index: 0, kind: input, shape index: {}]   ;;  %s858_s1 = inlined_call_operand.hbm [shape: f32[2,8,32], index: 1, kind: input, shape index: {}]   ;;  %s859_s2 = inlined_call_operand.hbm [shape: f32[32,32], index: 2, kind: input, shape index: {}]   ;;  %s860_s3 = inlined_call_operand.hbm [shape: f32[32,32], index: 3, kind: input, shape index: {}]   ;;  %s861_s4 = inlined_call_operand.vmem [shape: f32[1,32], index: 4, kind: input, shape index: {}]   ;;  %s862_s5 = inlined_call_operand.hbm [shape: f32[1,32], index: 5, kind: input, shape index: {}]   ;;  %s863_s6 = inlined_call_operand.vmem [shape: f32[16,2], index: 6, kind: input, shape index: {}]   ;;  %s864_s7 = inlined_call_operand.vmem [shape: f32[16,8], index: 7, kind: input, shape index: {}]   ;;  %s865_s8 = inlined_call_operand.vmem [shape: f32[2,16], index: 8, kind: input, shape index: {}]   ;;  %s866_s9 = inlined_call_operand.hbm [shape: f32[2,8], index: 9, kind: output, shape index: {}]  }
   0x1   :  { %15 = vsyncpa [#allocation6], 0 }
   0x2   :  { %16 = vsyncpa [#allocation9], 0 }
   0x3   :  { %17 = vsyncpa [#allocation4], 0  ;;  %s688_s30 = smov [#allocation5]   ;;  %s689_s11 = smov [#allocation2]  }
   0x4   :  { %s37_s10 = sshll.u32 %s688_s30, 4  ;;  %s25_s12 = sshll.u32 %s689_s11, 4  ;;  %s38_s10 = int_to_ptr.vmem [resolvable:$true] %s37_s10  ;;  %s748_s12 = int_to_ptr.vmem [resolvable:$true] %s25_s12 }
   0x5   :  { %s570_s15 = scalar_lea.hbm %s859_s2, 512 }
   0x6   :  { %p571_p0 = scmp.ne.s32.totalorder %s859_s2, %s570_s15  ;;  %p574_p1 = scmp.lt.u32.totalorder %s570_s15, %s859_s2 }
   0x8   :  { %p576_p2 = pnand %p574_p1, %p571_p0 }
   0xa   :  { %579 = shalt.err (!%p576_p2)
}
   0xb   :  { %s580_s20 = scalar_lea.vmem %s38_s10, 512  ;;  %p585_p4 = scmp.lt.s32.totalorder %s38_s10, %s38_s10 }
   0xc   :  { %p581_p3 = scmp.ne.s32.totalorder %s38_s10, %s580_s20  ;;  %p586_p5 = scmp.lt.s32.totalorder %s580_s20, %s580_s20 }
   0xe   :  { %p587_p6 = por %p586_p5, %p585_p4 }
  0x10   :  { %p588_p7 = pnand %p587_p6, %p581_p3 }
  0x12   :  { %591 = shalt.err (!%p588_p7)
}
  0x13   :  { %s690_s21 = smov 128   ;;  %s691_s22 = smov 8  }
  0x14   :  { %43 = dma.hbm_to_vmem [thread:$0]  %s859_s2, 512, %s38_s10, [#allocation6], %s690_s21, %s690_s21, %s691_s22  }
  0x15   :  { %s592_s27 = scalar_lea.hbm %s858_s1, 256 }
  0x16   :  { %p593_p8 = scmp.ne.s32.totalorder %s858_s1, %s592_s27  ;;  %p596_p9 = scmp.lt.u32.totalorder %s592_s27, %s858_s1 }
  0x18   :  { %p598_p10 = pnand %p596_p9, %p593_p8 }
  0x1a   :  { %601 = shalt.err (!%p598_p10)
}
  0x1b   :  { %s602_s13 = scalar_lea.vmem %s748_s12, 256  ;;  %p607_p12 = scmp.lt.s32.totalorder %s748_s12, %s748_s12 }
  0x1c   :  { %p603_p11 = scmp.ne.s32.totalorder %s748_s12, %s602_s13  ;;  %p608_p13 = scmp.lt.s32.totalorder %s602_s13, %s602_s13 }
  0x1e   :  { %p609_p0 = por %p608_p13, %p607_p12 }
  0x20   :  { %p610_p1 = pnand %p609_p0, %p603_p11 }
  0x22   :  { %613 = shalt.err (!%p610_p1)
}
  0x23   :  { %31 = dma.hbm_to_vmem [thread:$0]  %s858_s1, 256, %s748_s12, [#allocation3], %s690_s21, %s690_s21, %s691_s22  }
  0x24   :  { %s692_s14 = smov [#allocation7]   ;;  %s693_s16 = smov [#allocation8]  }
  0x25   :  { %s49_s15 = sshll.u32 %s692_s14, 4  ;;  %s64_s17 = sshll.u32 %s693_s16, 4  ;;  %s50_s15 = int_to_ptr.vmem [resolvable:$true] %s49_s15  ;;  %s65_s17 = int_to_ptr.vmem [resolvable:$true] %s64_s17 }
  0x26   :  { %s614_s20 = scalar_lea.hbm %s860_s3, 512 }
  0x27   :  { %p615_p2 = scmp.ne.s32.totalorder %s860_s3, %s614_s20  ;;  %p618_p3 = scmp.lt.u32.totalorder %s614_s20, %s860_s3 }
  0x29   :  { %p620_p4 = pnand %p618_p3, %p615_p2 }
  0x2b   :  { %623 = shalt.err (!%p620_p4)
}
  0x2c   :  { %s624_s1 = scalar_lea.vmem %s50_s15, 512  ;;  %p629_p6 = scmp.lt.s32.totalorder %s50_s15, %s50_s15 }
  0x2d   :  { %p625_p5 = scmp.ne.s32.totalorder %s50_s15, %s624_s1  ;;  %p630_p7 = scmp.lt.s32.totalorder %s624_s1, %s624_s1 }
  0x2f   :  { %p631_p8 = por %p630_p7, %p629_p6 }
  0x31   :  { %p632_p9 = pnand %p631_p8, %p625_p5 }
  0x33   :  { %635 = shalt.err (!%p632_p9)
}
  0x34   :  { %55 = dma.hbm_to_vmem [thread:$0]  %s860_s3, 512, %s50_s15, [#allocation6], %s690_s21, %s690_s21, %s691_s22  }
  0x35   :  { %s636_s30 = scalar_lea.hbm %s862_s5, 16 }
  0x36   :  { %p637_p10 = scmp.ne.s32.totalorder %s862_s5, %s636_s30  ;;  %p640_p11 = scmp.lt.u32.totalorder %s636_s30, %s862_s5 }
  0x38   :  { %p642_p12 = pnand %p640_p11, %p637_p10 }
  0x3a   :  { %645 = shalt.err (!%p642_p12)
}
  0x3b   :  { %s646_s14 = scalar_lea.vmem %s65_s17, 16  ;;  %s650_s16 = scalar_lea.vmem %s65_s17, 32 }
  0x3c   :  { %p647_p13 = scmp.ne.s32.totalorder %s65_s17, %s646_s14  ;;  %p651_p0 = scmp.lt.s32.totalorder %s65_s17, %s65_s17 }
  0x3d   :  { %p652_p1 = scmp.lt.s32.totalorder %s650_s16, %s646_s14 }
  0x3f   :  { %p653_p2 = por %p652_p1, %p651_p0 }
  0x41   :  { %p654_p3 = pnand %p653_p2, %p647_p13 }
  0x43   :  { %657 = shalt.err (!%p654_p3)
}
  0x44   :  { %67 = dma.hbm_to_vmem [thread:$0]  %s862_s5, 16, %s65_s17, [#allocation9]  }
  0x45   :  { %680 = dma.done.wait [#allocation3], 256  }
  0x46   :  { %681 = vsyncadd [#allocation3], 4294967040 }
  0x47   :  { %682 = dma.done.wait [#allocation6], 1024  }
  0x48   :  { %683 = vsyncadd [#allocation6], 4294966272 }
  0x49   :  { %684 = dma.done.wait [#allocation9], 16  }
  0x4a   :  { %685 = vsyncadd [#allocation9], 4294967280  ;;  %v694_v0 = vmov 0.0|0.0   ;;  %vm695_vm0 = vmmov 0   ;;  %v696_v1 = vmov 0.0   ;;  %v87_v2 = vld [vmem:[#allocation5] sm:$0xff] }
  0x4b   :  { %533 = vmatprep.subr.bf16.mxu0 %v694_v0  ;;  %507 = vmatprep.mubr.msk.f32.mxu0 %vm695_vm0, %v696_v1  ;;  %v88_v3 = vld [vmem:[#allocation5 + $0x8] sm:$0xff]  ;;  %v89_v4 = vld [vmem:[#allocation5 + $0x10] sm:$0xff]  ;;  %v90_v6 = vld [vmem:[#allocation5 + $0x18] sm:$0xff]  ;;  %vm98_vm1 = vcmask 261120   ;;  %vm180_vm2 = vcmask 15360   ;;  %vm187_vm3 = vcmask 1041408  }
  0x4c   :  { %v534_v5 = vpack.c.bf16 %v88_v3, %v87_v2  ;;  %v537_v7 = vpack.c.bf16 %v90_v6, %v89_v4  ;;  %v86_v8 = vld [vmem:[%s857_s0] sm:$0x3]  ;;  %v174_v11 = vld [vmem:[#allocation7] sm:$0xff]  ;;  %v175_v12 = vld [vmem:[#allocation7 + $0x8] sm:$0xff]  ;;  %vm369_vm4 = vcmask 130048   ;;  %vm443_vm5 = vcmask 58368  }
  0x4d   :  { %v178_v9 = vld [vmem:[%s863_s6] sm:$0xff]  ;;  %v177_v15 = vld [vmem:[#allocation7 + $0x18] sm:$0xff]  ;;  %v539_v18 = vpack.c.bf16 %v175_v12, %v174_v11  ;;  %v480_v25 = vld [vmem:[#allocation8] ss:$0 sm:$0xff] }
  0x4e   :  { %535 = vmatpush3.bf16.msra.mxu0 %v534_v5  ;;  %512 = vmatprep.mubr.msk.f32.mxu1 %vm180_vm2, %v178_v9  ;;  %v473_v10 = vld [vmem:[%s861_s4] ss:$0 sm:$0xff]  ;;  %v179_v19 = vld [vmem:[%s863_s6 + $0x8] sm:$0xff] }
  0x4f   :  { %536 = vmatprep.subr.bf16.mxu0 %v694_v0  ;;  %v176_v14 = vld [vmem:[#allocation7 + $0x10] sm:$0xff]  ;;  %v173_v22 = vld [vmem:[#allocation2 + $0x8] sm:$0xff] }
  0x50   :  { %v543_v20 = vpack.c.bf16 %v177_v15, %v176_v14  ;;  %v172_v21 = vld [vmem:[#allocation2] sm:$0xff]  ;;  %v366_v34 = vld [vmem:[%s864_s7 + $0x8] sm:$0xff] }
  0x51   :  { %v365_v33 = vld [vmem:[%s864_s7] sm:$0xff]  ;;  %s697_s7 = smov [#allocation10]  }
  0x52   :  { %538 = vmatpush3.bf16.msra.mxu0 %v537_v7  ;;  %v364_v39 = vld [vmem:[%s865_s8] sm:$0x3]  ;;  %s462_s8 = sshll.u32 %s697_s7, 4  ;;  %s463_s8 = int_to_ptr.vmem [resolvable:$true] %s462_s8 }
  0x53   :  { %547 = vmatprep.subr.bf16.mxu0 %v694_v0  ;;  %s658_s1 = scalar_lea.vmem %s463_s8, 32  ;;  %p663_p5 = scmp.lt.s32.totalorder %s463_s8, %s463_s8 }
  0x54   :  { %p659_p4 = scmp.ne.s32.totalorder %s463_s8, %s658_s1  ;;  %p664_p6 = scmp.lt.s32.totalorder %s658_s1, %s658_s1 }
  0x55   :  { %508 = vmatmul.mubr.msk.f32.vlgmr.msra.gmra.mrb[0].mxu0 %vm98_vm1, %v86_v8 }
  0x56   :  { %530 = vmatprep.mubr.msk.f32.mxu0 %vm695_vm0, %v696_v1  ;;  %p665_p7 = por %p664_p6, %p663_p5 }
  0x58   :  { %p666_p8 = pnand %p665_p7, %p659_p4 }
 0x128   :  { %v168_v13 = vpop.f32.mrb[0].mxu0 }
 0x129   :  { %v169_v16 = vadd.f32 %v473_v10, %v168_v13  ;;  %v509_v17 = vpop.f32.mrb[1].mxu0 }
 0x12b   :  { %510 = vmatprep.subr.msk.mxu1 %vm187_vm3, %v169_v16 }
 0x12c   :  { %511 = vmatpush3.msk.msra.mxu1 %vm187_vm3, %v169_v16 }
 0x12d   :  { %513 = vmatmul.mubr.msk.f32.vlgmr.msra.gmra.mrb[0].mxu1 %vm180_vm2, %v179_v19  ;;  %540 = vmatprep.subr.bf16.mxu1 %v539_v18 }
 0x12e   :  { %542 = vmatpush3.bf16.msra.mxu1 %v539_v18  ;;  %523 = vmatprep.mubr.msk.f32.mxu1 %vm98_vm1, %v172_v21 }
 0x12f   :  { %544 = vmatprep.subr.bf16.mxu1 %v543_v20 }
 0x132   :  { %546 = vmatpush3.bf16.msra.mxu1 %v543_v20 }
 0x135   :  { %524 = vmatmul.mubr.msk.f32.vlgmr.msra.gmra.mrb[0].mxu1 %vm98_vm1, %v173_v22 }
 0x208   :  { %v525_v23 = vpop.f32.mrb[0].mxu1 }
 0x209   :  { %562 = vtanh.f32 %v525_v23  ;;  %v338_v24 = vpop.f32.mrb[1].mxu1 }
 0x20a   :  { %564 = vtanh.f32 %v338_v24 }
 0x213   :  { %v563_v26 = vpop.eup %562 }
 0x214   :  { %v565_v27 = vpop.eup %564  ;;  %v357_v30 = vmul.f32 %v563_v26, %v480_v25 }
 0x215   :  { %v356_v28 = vmul.f32 %v565_v27, %v480_v25 }
 0x216   :  { %v361_v31 = vsel %vm98_vm1, %v357_v30, 0.0 }
 0x217   :  { %v358_v29 = vsel %vm98_vm1, %v356_v28, 0.0 }
 0x218   :  { %359 = vadd.xlane.f32.xlu0 %v358_v29 }
 0x21c   :  { %362 = vadd.xlane.f32.xlu0 %v361_v31 }
 0x2a5   :  { %v360_v32 = vpop.xlane.xlu0 %359 }
 0x2a6   :  { %v367_v36 = vmul.f32 %v365_v33, %v360_v32 }
 0x2a9   :  { %v363_v35 = vpop.xlane.xlu0 %362 }
 0x2aa   :  { %v368_v37 = vmul.f32 %v366_v34, %v363_v35 }
 0x2ac   :  { %v548_v38 = vpack.c.bf16 %v368_v37, %v367_v36 }
 0x2ae   :  { %549 = vmatpush3.bf16.msra.mxu0 %v548_v38 }
 0x2b1   :  { %531 = vmatmul.mubr.msk.f32.vlgmr.msra.gmra.mrb[2].mxu0 %vm369_vm4, %v364_v39 }
 0x384   :  { %v439_v40 = vpop.f32.mrb[2].mxu0 }
 0x385   :  { %v532_v41 = vpop.f32.mrb[3].mxu0  ;;  %v444_v42 = vsel %vm443_vm5, %v439_v40, -inf }
 0x386   :  { %445 = vmax.xlane.f32.xlu1 %v444_v42 }
 0x413   :  { %v446_v43 = vpop.xlane.xlu1 %445 }
 0x414   :  { %v447_v44 = vsub.f32 %v439_v40, %v446_v43 }
 0x416   :  { %v448_v45 = vmul.f32 1.442695, %v447_v44 }
 0x418   :  { %566 = vpow2.f32 %v448_v45 }
 0x422   :  { %v567_v46 = vpop.eup %566 }
 0x423   :  { %v450_v47 = vsel %vm443_vm5, %v567_v46, 0.0 }
 0x424   :  { %451 = vadd.xlane.f32.xlu1 %v450_v47 }
 0x4b1   :  { %v452_v48 = vpop.xlane.xlu1 %451 }
 0x4b2   :  { %568 = vrcp.f32 %v452_v48 }
 0x4bc   :  { %v569_v49 = vpop.eup %568 }
 0x4bd   :  { %v454_v50 = vmul.f32 %v569_v49, %v567_v46 }
 0x4bf   :  { %455 = vst.msk [vmem:[#allocation10] sm:$0x3] %vm443_vm5, %v454_v50 }
 0x4c0   :  { %669 = shalt.err (!%p666_p8)
}
 0x4c1   :  { %s670_s28 = scalar_lea.hbm %s866_s9, 32 }
 0x4c2   :  { %p671_p9 = scmp.ne.s32.totalorder %s866_s9, %s670_s28  ;;  %p674_p10 = scmp.lt.u32.totalorder %s670_s28, %s866_s9 }
 0x4c4   :  { %p676_p11 = pnand %p674_p10, %p671_p9 }
 0x4c6   :  { %679 = shalt.err (!%p676_p11)
}
 0x4c7   :  { %465 = dma.vmem_to_hbm [thread:$0]  %s463_s8, 32, %s866_s9, [#allocation4]  }
 0x4c8   :  { %686 = dma.done.wait [#allocation4], 32  }
 0x4c9   :  { %687 = vsyncadd [#allocation4], 4294967264 }
 0x4ca   :  { %469 = vsyncpa [#allocation3], 1 }
 0x4cb   :  { %470 = vsyncpa [#allocation6], 1 }
 0x4cc   :  { %471 = vsyncpa [#allocation9], 1 }
 0x4cd   :  { %472 = vsyncpa [#allocation4], 1 }

</bundles_post_ra>
